<compile_context>
chip_gen: v7x
topology: tpu7x:2x2x1
jax: 0.10.0
libtpu: 0.0.40
codegen_flags: <defaults>
</compile_context>

<pallas_src>
import jax
import jax.numpy as jnp
from jax import lax
from jax.experimental import pallas as pl
from jax.experimental.pallas import tpu as pltpu
import numpy as np


def _leaky_relu(x, slope=0.01):
    # F.leaky_relu default negative_slope = 0.01
    return jnp.where(x >= 0, x, slope * x)


def embedder_lstm_kernel(
    # inputs
    h_ref,      # (S, D)        f32 lstm input sequence
    wih_ref,    # (D, 4H)       bf16 weight_ih^T, gate columns reordered to [f, o, i, g]
    whh_ref,    # (H, 4H)       bf16 weight_hh^T, same column order (2 bf16 vregs)
    bias_ref,   # (1, 4H)       f32 bias_ih + bias_hh, same column order
    hc0_ref,    # (2, 4H)       f32 [h0 | 0 ; c0 | 0]  (state lives in lane group 0)
    wl2i_ref,   # (H, OUT_W)    bf16 l2i.weight^T zero-padded; real cols [0, H2)
    bl2i_ref,   # (1, OUT_W)    f32  l2i.bias padded to the same lanes
    we2c_ref,   # (H2, OUT_W)   bf16 e2c.weight^T zero-padded; real cols [H2, H2+NB)
    be2c_ref,   # (1, OUT_W)    f32  e2c.bias padded to the same lanes
    # output
    out_ref,    # (S+2, OUT_W)  f32 [emb | pc | 0] rows, then [h1|0], [c1|0]
):
    S = h_ref.shape[0]
    G4 = whh_ref.shape[1]          # 4H (== OUT_W == 128 for this config)
    H = G4 // 4
    H2 = we2c_ref.shape[0]
    f32, bf16 = jnp.float32, jnp.bfloat16

    # ---- hoisted input projection: one bf16 MXU pass for the whole sequence
    gx = jnp.dot(h_ref[...].astype(bf16), wih_ref[...],
                 preferred_element_type=f32) + bias_ref[...]            # (S, 4H) f32

    # ---- recurrent weight hoisted out of the loop (2 bf16 vregs)
    whh = whh_ref[...]

    # ---- loop-invariant lane masks. gate-group order along the 4H axis is [f, o, i, g]
    lane = lax.broadcasted_iota(jnp.int32, (1, G4), 1)
    is_g = lane >= 3 * H                      # group 3 holds the cell-candidate gate g
    fix_a = jnp.where(is_g, 1.0, 0.5).astype(f32)   # tanh pre-scale and fixup slope
    fix_b = jnp.where(is_g, 0.0, 0.5).astype(f32)   # fixup offset (sigmoid groups only)
    grp0 = lane < H                           # lane group 0 (c_t / h_t live here)

    def rot1(x):   # result group k = x group (k+1) mod 4   (static lane slices + concat)
        return jnp.concatenate([x[:, H:], x[:, :H]], axis=-1)

    def rot2(x):   # result group k = x group (k+2) mod 4
        return jnp.concatenate([x[:, 2 * H:], x[:, :2 * H]], axis=-1)

    h_lhs = hc0_ref[0:1, 0:H]      # (1, H)  h0, lane offset 0 -> free slice
    c_full = hc0_ref[1:2, :]       # (1, 4H) c0 in group 0, zeros elsewhere
    h_full = jnp.concatenate([h_lhs, jnp.zeros((1, G4 - H), f32)], axis=-1)

    hs = []
    for t in range(S):             # S is static: fully unrolled, all indices static
        gates = gx[t:t + 1, :] + jnp.dot(h_lhs.astype(bf16), whh,
                                         preferred_element_type=f32)    # (1,4H) [f,o,i,g]
        # single EUP push: sigmoid(x) = 0.5 * (1 + tanh(x/2)) on the f/o/i groups
        t_all = jnp.tanh(gates * fix_a)
        act = t_all * fix_a + fix_b            # [sig f, sig o, sig i, tanh g]
        rolled = rot1(act)                     # [sig o, sig i, tanh g, sig f]
        prod = act * jnp.where(grp0, c_full, rolled)   # g0 = f*c_prev, g2 = i*g
        c_full = prod + rot2(prod)             # g0 = f*c_prev + i*g = c_t (rest junk, finite)
        h_full = rolled * jnp.tanh(c_full)     # g0 = sig(o) * tanh(c_t) = h_t
        h_lhs = h_full[:, 0:H]                 # lane offset 0 -> free
        hs.append(h_lhs)

    # ---- epilogue: two dense layers over the whole sequence, bf16 MXU, lane-dense slab
    lstm_out = jnp.concatenate(hs, axis=0)                               # (S, H) in vregs
    emb_pad = jnp.dot(_leaky_relu(lstm_out).astype(bf16), wl2i_ref[...],
                      preferred_element_type=f32) + bl2i_ref[...]        # emb at lanes [0,H2)
    pc_pad = jnp.dot(_leaky_relu(emb_pad[:, 0:H2]).astype(bf16), we2c_ref[...],
                     preferred_element_type=f32) + be2c_ref[...]         # pc at [H2,H2+NB)
    top = emb_pad + pc_pad                                               # [emb | pc | 0]

    state_rows = jnp.where(grp0, jnp.concatenate([h_full, c_full], axis=0), 0.0)  # (2,4H)
    out_ref[...] = jnp.concatenate([top, state_rows], axis=0)            # one lane-dense store


def embedder_forward(h, params):
    """Returns (embedding, predicted_context, (h1, c1)).

    The PyTorch module mutates self.h_lstm / self.c_lstm in place; here the new LSTM
    state is returned to the caller instead (functional equivalent)."""
    S, _ = h.shape
    H = params["w_hh_t"].shape[0]
    H2 = params["w_l2i_t"].shape[1]
    NB = params["w_e2c_t"].shape[1]
    OUT_W = 128
    # this fast path assumes the 4H gate axis exactly fills one 128-lane vreg
    assert 4 * H == OUT_W and H2 + NB <= OUT_W and H <= OUT_W

    # ---- one-time parameter packing (could be cached; cheap XLA ops outside the kernel)
    def permute_gates(w):   # torch gate order [i, f, g, o] -> kernel order [f, o, i, g]
        i, f, g, o = w[..., :H], w[..., H:2 * H], w[..., 2 * H:3 * H], w[..., 3 * H:]
        return jnp.concatenate([f, o, i, g], axis=-1)

    wih = permute_gates(params["w_ih_t"]).astype(jnp.bfloat16)            # (D, 4H)
    whh = permute_gates(params["w_hh_t"]).astype(jnp.bfloat16)            # (H, 4H)
    bias = permute_gates(params["bias_gates"]).astype(jnp.float32)        # (1, 4H)

    hc0 = jnp.concatenate([params["h0"], params["c0"]], axis=0)           # (2, H)
    hc0 = jnp.pad(hc0, ((0, 0), (0, 4 * H - H)))                          # (2, 4H)

    wl2i = jnp.pad(params["w_l2i_t"], ((0, 0), (0, OUT_W - H2))).astype(jnp.bfloat16)
    bl2i = jnp.pad(params["b_l2i"], ((0, 0), (0, OUT_W - H2)))
    we2c = jnp.pad(params["w_e2c_t"],
                   ((0, 0), (H2, OUT_W - H2 - NB))).astype(jnp.bfloat16)  # cols at [H2,H2+NB)
    be2c = jnp.pad(params["b_e2c"], ((0, 0), (H2, OUT_W - H2 - NB)))

    vmem = pl.BlockSpec(memory_space=pltpu.MemorySpace.VMEM)
    slab = pl.pallas_call(
        embedder_lstm_kernel,
        out_shape=jax.ShapeDtypeStruct((S + 2, OUT_W), jnp.float32),
        in_specs=[vmem] * 9,
        out_specs=vmem,
    )(h, wih, whh, bias, hc0, wl2i, bl2i, we2c, be2c)

    emb = slab[:S, :H2]
    pc = slab[:S, H2:H2 + NB]
    h1 = slab[S:S + 1, :H]
    c1 = slab[S + 1:S + 2, :H]
    return emb, pc, (h1, c1)


# ------------------------- parameter construction ------------------------- #

def _orthogonal(key, shape):
    """Deterministic orthogonal init (mimics torch.nn.init.orthogonal_)."""
    rows, cols = shape
    n, m = max(rows, cols), min(rows, cols)
    a = jax.random.normal(key, (n, m), dtype=jnp.float32)
    q, r = jnp.linalg.qr(a)
    q = q * jnp.sign(jnp.diagonal(r))
    if rows < cols:
        q = q.T
    return q[:rows, :cols].astype(jnp.float32)


def make_params(key, input_dim, embedding_size, num_barcodes):
    H = embedding_size
    H2 = embedding_size // 2
    NB = num_barcodes
    ks = jax.random.split(key, 8)

    w_ih = _orthogonal(ks[0], (4 * H, input_dim))   # torch weight_ih_l0
    w_hh = _orthogonal(ks[1], (4 * H, H))           # torch weight_hh_l0
    w_l2i = _orthogonal(ks[2], (H2, H))             # l2i.weight
    w_e2c = _orthogonal(ks[3], (NB, H2))            # e2c.weight
    # biases: torch.nn.init.constant_(bias, 0)
    bias_gates = jnp.zeros((1, 4 * H), jnp.float32)  # bias_ih + bias_hh
    b_l2i = jnp.zeros((1, H2), jnp.float32)
    b_e2c = jnp.zeros((1, NB), jnp.float32)
    # emb_get_init_states: randn(1, H) * 0.1  (not touched by reset_parameter)
    h0 = 0.1 * jax.random.normal(ks[4], (1, H), dtype=jnp.float32)
    c0 = 0.1 * jax.random.normal(ks[5], (1, H), dtype=jnp.float32)

    return dict(
        w_ih_t=w_ih.T, w_hh_t=w_hh.T, bias_gates=bias_gates,
        h0=h0, c0=c0,
        w_l2i_t=w_l2i.T, b_l2i=b_l2i,
        w_e2c_t=w_e2c.T, b_e2c=b_e2c,
    )


# ------------------------------ reference -------------------------------- #

def reference_forward(h, p):
    H = p["w_hh_t"].shape[0]
    h_t, c_t = p["h0"], p["c0"]
    outs = []
    for t in range(h.shape[0]):
        x_t = h[t:t + 1, :]
        gates = x_t @ p["w_ih_t"] + h_t @ p["w_hh_t"] + p["bias_gates"]
        i_g = jax.nn.sigmoid(gates[:, :H])
        f_g = jax.nn.sigmoid(gates[:, H:2 * H])
        g_g = jnp.tanh(gates[:, 2 * H:3 * H])
        o_g = jax.nn.sigmoid(gates[:, 3 * H:])
        c_t = f_g * c_t + i_g * g_g
        h_t = o_g * jnp.tanh(c_t)
        outs.append(h_t)
    lstm_out = jnp.concatenate(outs, axis=0)
    x = _leaky_relu(lstm_out) @ p["w_l2i_t"] + p["b_l2i"]
    pc = _leaky_relu(x) @ p["w_e2c_t"] + p["b_e2c"]
    return x, pc, (h_t, c_t)


if __name__ == "__main__":
    # exp_settings used: dim_hidden_lstm=32, embedding_size=32, num_barcodes=8,
    # mem_mode='LSTM', emb_loss='groundtruth' (so e2c is used), dropout unused in this branch.
    SEQ, INPUT_DIM, EMB, NB = 8, 32, 32, 8

    key = jax.random.PRNGKey(0)
    k_param, k_inp = jax.random.split(key)
    params = make_params(k_param, INPUT_DIM, EMB, NB)
    h = jax.random.normal(k_inp, (SEQ, INPUT_DIM), dtype=jnp.float32)

    emb, pc, (h1, c1) = embedder_forward(h, params)
    jax.block_until_ready((emb, pc, h1, c1))

    emb_ref, pc_ref, (h1_ref, c1_ref) = reference_forward(h, params)
    # bf16 MXU operands on all matmuls (incl. the compounding recurrent path) -> 2e-2 budget.
    np.testing.assert_allclose(np.asarray(emb), np.asarray(emb_ref), rtol=2e-2, atol=2e-2)
    np.testing.assert_allclose(np.asarray(pc), np.asarray(pc_ref), rtol=2e-2, atol=2e-2)
    np.testing.assert_allclose(np.asarray(h1), np.asarray(h1_ref), rtol=2e-2, atol=2e-2)
    np.testing.assert_allclose(np.asarray(c1), np.asarray(c1_ref), rtol=2e-2, atol=2e-2)

    print("KERNEL_OK")
</pallas_src>

<mosaic_0001>
module attributes {stable_mosaic.version = 11 : i64} {
  func.func @embedder_lstm_kernel(%arg0: memref<8x32xf32, #tpu.memory_space<vmem>>, %arg1: memref<32x128xbf16, #tpu.memory_space<vmem>>, %arg2: memref<32x128xbf16, #tpu.memory_space<vmem>>, %arg3: memref<1x128xf32, #tpu.memory_space<vmem>>, %arg4: memref<2x128xf32, #tpu.memory_space<vmem>>, %arg5: memref<32x128xbf16, #tpu.memory_space<vmem>>, %arg6: memref<1x128xf32, #tpu.memory_space<vmem>>, %arg7: memref<16x128xbf16, #tpu.memory_space<vmem>>, %arg8: memref<1x128xf32, #tpu.memory_space<vmem>>, %arg9: memref<10x128xf32, #tpu.memory_space<vmem>>) attributes {dimension_semantics = [], scalar_prefetch = 0 : i64, scratch_operands = 0 : i64, tpu.core_type = #tpu.core_type<tc>} {
    %c0 = arith.constant 0 : index
    %c0_0 = arith.constant 0 : index
    %0 = vector.load %arg0[%c0, %c0_0] : memref<8x32xf32, #tpu.memory_space<vmem>>, vector<8x32xf32>
    %1 = arith.truncf %0 : vector<8x32xf32> to vector<8x32xbf16>
    %c0_1 = arith.constant 0 : index
    %c0_2 = arith.constant 0 : index
    %2 = vector.load %arg1[%c0_1, %c0_2] : memref<32x128xbf16, #tpu.memory_space<vmem>>, vector<32x128xbf16>
    %cst = arith.constant dense<0.000000e+00> : vector<8x128xf32>
    %3 = tpu.matmul %1, %2, %cst {dimension_numbers = #tpu.dot_dimension_numbers<[1], [0], [0], [1], [0, 0, 1, 1], [], []>} : vector<8x32xbf16>, vector<32x128xbf16>, vector<8x128xf32> -> vector<8x128xf32>
    %c0_3 = arith.constant 0 : index
    %c0_4 = arith.constant 0 : index
    %4 = vector.load %arg3[%c0_3, %c0_4] : memref<1x128xf32, #tpu.memory_space<vmem>>, vector<1x128xf32>
    %5 = vector.broadcast %4 : vector<1x128xf32> to vector<8x128xf32>
    %6 = arith.addf %3, %5 : vector<8x128xf32>
    %c0_5 = arith.constant 0 : index
    %c0_6 = arith.constant 0 : index
    %7 = vector.load %arg2[%c0_5, %c0_6] : memref<32x128xbf16, #tpu.memory_space<vmem>>, vector<32x128xbf16>
    %8 = tpu.iota {dimensions = array<i32: 1>} : vector<1x128xi32>
    %c96_i32 = arith.constant 96 : i32
    %9 = vector.broadcast %c96_i32 : i32 to vector<1x128xi32>
    %10 = arith.cmpi sge, %8, %9 : vector<1x128xi32>
    %cst_7 = arith.constant 1.000000e+00 : f32
    %cst_8 = arith.constant 5.000000e-01 : f32
    %11 = vector.broadcast %cst_7 : f32 to vector<1x128xf32>
    %12 = vector.broadcast %cst_8 : f32 to vector<1x128xf32>
    %13 = arith.select %10, %11, %12 : vector<1x128xi1>, vector<1x128xf32>
    %cst_9 = arith.constant 0.000000e+00 : f32
    %cst_10 = arith.constant 5.000000e-01 : f32
    %14 = vector.broadcast %cst_9 : f32 to vector<1x128xf32>
    %15 = vector.broadcast %cst_10 : f32 to vector<1x128xf32>
    %16 = arith.select %10, %14, %15 : vector<1x128xi1>, vector<1x128xf32>
    %c32_i32 = arith.constant 32 : i32
    %17 = vector.broadcast %c32_i32 : i32 to vector<1x128xi32>
    %18 = arith.cmpi slt, %8, %17 : vector<1x128xi32>
    %c0_11 = arith.constant 0 : index
    %c0_12 = arith.constant 0 : index
    %19 = vector.load %arg4[%c0_11, %c0_12] : memref<2x128xf32, #tpu.memory_space<vmem>>, vector<1x32xf32>
    %c1 = arith.constant 1 : index
    %c0_13 = arith.constant 0 : index
    %20 = vector.load %arg4[%c1, %c0_13] : memref<2x128xf32, #tpu.memory_space<vmem>>, vector<1x128xf32>
    %21 = vector.extract_strided_slice %6 {offsets = [0, 0], sizes = [1, 128], strides = [1, 1]} : vector<8x128xf32> to vector<1x128xf32>
    %22 = arith.truncf %19 : vector<1x32xf32> to vector<1x32xbf16>
    %cst_14 = arith.constant dense<0.000000e+00> : vector<1x128xf32>
    %23 = tpu.matmul %22, %7, %cst_14 {dimension_numbers = #tpu.dot_dimension_numbers<[1], [0], [0], [1], [0, 0, 1, 1], [], []>} : vector<1x32xbf16>, vector<32x128xbf16>, vector<1x128xf32> -> vector<1x128xf32>
    %24 = arith.addf %21, %23 : vector<1x128xf32>
    %25 = arith.mulf %24, %13 : vector<1x128xf32>
    %26 = math.tanh %25 : vector<1x128xf32>
    %27 = arith.mulf %26, %13 : vector<1x128xf32>
    %28 = arith.addf %27, %16 : vector<1x128xf32>
    %29 = vector.extract_strided_slice %28 {offsets = [0, 32], sizes = [1, 96], strides = [1, 1]} : vector<1x128xf32> to vector<1x96xf32>
    %30 = vector.extract_strided_slice %28 {offsets = [0, 0], sizes = [1, 32], strides = [1, 1]} : vector<1x128xf32> to vector<1x32xf32>
    %31 = tpu.concatenate %29, %30 in 1 : vector<1x96xf32>, vector<1x32xf32> -> vector<1x128xf32>
    %32 = arith.select %18, %20, %31 : vector<1x128xi1>, vector<1x128xf32>
    %33 = arith.mulf %28, %32 : vector<1x128xf32>
    %34 = vector.extract_strided_slice %33 {offsets = [0, 64], sizes = [1, 64], strides = [1, 1]} : vector<1x128xf32> to vector<1x64xf32>
    %35 = vector.extract_strided_slice %33 {offsets = [0, 0], sizes = [1, 64], strides = [1, 1]} : vector<1x128xf32> to vector<1x64xf32>
    %36 = tpu.concatenate %34, %35 in 1 : vector<1x64xf32>, vector<1x64xf32> -> vector<1x128xf32>
    %37 = arith.addf %33, %36 : vector<1x128xf32>
    %38 = math.tanh %37 : vector<1x128xf32>
    %39 = arith.mulf %31, %38 : vector<1x128xf32>
    %40 = vector.extract_strided_slice %39 {offsets = [0, 0], sizes = [1, 32], strides = [1, 1]} : vector<1x128xf32> to vector<1x32xf32>
    %41 = vector.extract_strided_slice %6 {offsets = [1, 0], sizes = [1, 128], strides = [1, 1]} : vector<8x128xf32> to vector<1x128xf32>
    %42 = arith.truncf %40 : vector<1x32xf32> to vector<1x32xbf16>
    %cst_15 = arith.constant dense<0.000000e+00> : vector<1x128xf32>
    %43 = tpu.matmul %42, %7, %cst_15 {dimension_numbers = #tpu.dot_dimension_numbers<[1], [0], [0], [1], [0, 0, 1, 1], [], []>} : vector<1x32xbf16>, vector<32x128xbf16>, vector<1x128xf32> -> vector<1x128xf32>
    %44 = arith.addf %41, %43 : vector<1x128xf32>
    %45 = arith.mulf %44, %13 : vector<1x128xf32>
    %46 = math.tanh %45 : vector<1x128xf32>
    %47 = arith.mulf %46, %13 : vector<1x128xf32>
    %48 = arith.addf %47, %16 : vector<1x128xf32>
    %49 = vector.extract_strided_slice %48 {offsets = [0, 32], sizes = [1, 96], strides = [1, 1]} : vector<1x128xf32> to vector<1x96xf32>
    %50 = vector.extract_strided_slice %48 {offsets = [0, 0], sizes = [1, 32], strides = [1, 1]} : vector<1x128xf32> to vector<1x32xf32>
    %51 = tpu.concatenate %49, %50 in 1 : vector<1x96xf32>, vector<1x32xf32> -> vector<1x128xf32>
    %52 = arith.select %18, %37, %51 : vector<1x128xi1>, vector<1x128xf32>
    %53 = arith.mulf %48, %52 : vector<1x128xf32>
    %54 = vector.extract_strided_slice %53 {offsets = [0, 64], sizes = [1, 64], strides = [1, 1]} : vector<1x128xf32> to vector<1x64xf32>
    %55 = vector.extract_strided_slice %53 {offsets = [0, 0], sizes = [1, 64], strides = [1, 1]} : vector<1x128xf32> to vector<1x64xf32>
    %56 = tpu.concatenate %54, %55 in 1 : vector<1x64xf32>, vector<1x64xf32> -> vector<1x128xf32>
    %57 = arith.addf %53, %56 : vector<1x128xf32>
    %58 = math.tanh %57 : vector<1x128xf32>
    %59 = arith.mulf %51, %58 : vector<1x128xf32>
    %60 = vector.extract_strided_slice %59 {offsets = [0, 0], sizes = [1, 32], strides = [1, 1]} : vector<1x128xf32> to vector<1x32xf32>
    %61 = vector.extract_strided_slice %6 {offsets = [2, 0], sizes = [1, 128], strides = [1, 1]} : vector<8x128xf32> to vector<1x128xf32>
    %62 = arith.truncf %60 : vector<1x32xf32> to vector<1x32xbf16>
    %cst_16 = arith.constant dense<0.000000e+00> : vector<1x128xf32>
    %63 = tpu.matmul %62, %7, %cst_16 {dimension_numbers = #tpu.dot_dimension_numbers<[1], [0], [0], [1], [0, 0, 1, 1], [], []>} : vector<1x32xbf16>, vector<32x128xbf16>, vector<1x128xf32> -> vector<1x128xf32>
    %64 = arith.addf %61, %63 : vector<1x128xf32>
    %65 = arith.mulf %64, %13 : vector<1x128xf32>
    %66 = math.tanh %65 : vector<1x128xf32>
    %67 = arith.mulf %66, %13 : vector<1x128xf32>
    %68 = arith.addf %67, %16 : vector<1x128xf32>
    %69 = vector.extract_strided_slice %68 {offsets = [0, 32], sizes = [1, 96], strides = [1, 1]} : vector<1x128xf32> to vector<1x96xf32>
    %70 = vector.extract_strided_slice %68 {offsets = [0, 0], sizes = [1, 32], strides = [1, 1]} : vector<1x128xf32> to vector<1x32xf32>
    %71 = tpu.concatenate %69, %70 in 1 : vector<1x96xf32>, vector<1x32xf32> -> vector<1x128xf32>
    %72 = arith.select %18, %57, %71 : vector<1x128xi1>, vector<1x128xf32>
    %73 = arith.mulf %68, %72 : vector<1x128xf32>
    %74 = vector.extract_strided_slice %73 {offsets = [0, 64], sizes = [1, 64], strides = [1, 1]} : vector<1x128xf32> to vector<1x64xf32>
    %75 = vector.extract_strided_slice %73 {offsets = [0, 0], sizes = [1, 64], strides = [1, 1]} : vector<1x128xf32> to vector<1x64xf32>
    %76 = tpu.concatenate %74, %75 in 1 : vector<1x64xf32>, vector<1x64xf32> -> vector<1x128xf32>
    %77 = arith.addf %73, %76 : vector<1x128xf32>
    %78 = math.tanh %77 : vector<1x128xf32>
    %79 = arith.mulf %71, %78 : vector<1x128xf32>
    %80 = vector.extract_strided_slice %79 {offsets = [0, 0], sizes = [1, 32], strides = [1, 1]} : vector<1x128xf32> to vector<1x32xf32>
    %81 = vector.extract_strided_slice %6 {offsets = [3, 0], sizes = [1, 128], strides = [1, 1]} : vector<8x128xf32> to vector<1x128xf32>
    %82 = arith.truncf %80 : vector<1x32xf32> to vector<1x32xbf16>
    %cst_17 = arith.constant dense<0.000000e+00> : vector<1x128xf32>
    %83 = tpu.matmul %82, %7, %cst_17 {dimension_numbers = #tpu.dot_dimension_numbers<[1], [0], [0], [1], [0, 0, 1, 1], [], []>} : vector<1x32xbf16>, vector<32x128xbf16>, vector<1x128xf32> -> vector<1x128xf32>
    %84 = arith.addf %81, %83 : vector<1x128xf32>
    %85 = arith.mulf %84, %13 : vector<1x128xf32>
    %86 = math.tanh %85 : vector<1x128xf32>
    %87 = arith.mulf %86, %13 : vector<1x128xf32>
    %88 = arith.addf %87, %16 : vector<1x128xf32>
    %89 = vector.extract_strided_slice %88 {offsets = [0, 32], sizes = [1, 96], strides = [1, 1]} : vector<1x128xf32> to vector<1x96xf32>
    %90 = vector.extract_strided_slice %88 {offsets = [0, 0], sizes = [1, 32], strides = [1, 1]} : vector<1x128xf32> to vector<1x32xf32>
    %91 = tpu.concatenate %89, %90 in 1 : vector<1x96xf32>, vector<1x32xf32> -> vector<1x128xf32>
    %92 = arith.select %18, %77, %91 : vector<1x128xi1>, vector<1x128xf32>
    %93 = arith.mulf %88, %92 : vector<1x128xf32>
    %94 = vector.extract_strided_slice %93 {offsets = [0, 64], sizes = [1, 64], strides = [1, 1]} : vector<1x128xf32> to vector<1x64xf32>
    %95 = vector.extract_strided_slice %93 {offsets = [0, 0], sizes = [1, 64], strides = [1, 1]} : vector<1x128xf32> to vector<1x64xf32>
    %96 = tpu.concatenate %94, %95 in 1 : vector<1x64xf32>, vector<1x64xf32> -> vector<1x128xf32>
    %97 = arith.addf %93, %96 : vector<1x128xf32>
    %98 = math.tanh %97 : vector<1x128xf32>
    %99 = arith.mulf %91, %98 : vector<1x128xf32>
    %100 = vector.extract_strided_slice %99 {offsets = [0, 0], sizes = [1, 32], strides = [1, 1]} : vector<1x128xf32> to vector<1x32xf32>
    %101 = vector.extract_strided_slice %6 {offsets = [4, 0], sizes = [1, 128], strides = [1, 1]} : vector<8x128xf32> to vector<1x128xf32>
    %102 = arith.truncf %100 : vector<1x32xf32> to vector<1x32xbf16>
    %cst_18 = arith.constant dense<0.000000e+00> : vector<1x128xf32>
    %103 = tpu.matmul %102, %7, %cst_18 {dimension_numbers = #tpu.dot_dimension_numbers<[1], [0], [0], [1], [0, 0, 1, 1], [], []>} : vector<1x32xbf16>, vector<32x128xbf16>, vector<1x128xf32> -> vector<1x128xf32>
    %104 = arith.addf %101, %103 : vector<1x128xf32>
    %105 = arith.mulf %104, %13 : vector<1x128xf32>
    %106 = math.tanh %105 : vector<1x128xf32>
    %107 = arith.mulf %106, %13 : vector<1x128xf32>
    %108 = arith.addf %107, %16 : vector<1x128xf32>
    %109 = vector.extract_strided_slice %108 {offsets = [0, 32], sizes = [1, 96], strides = [1, 1]} : vector<1x128xf32> to vector<1x96xf32>
    %110 = vector.extract_strided_slice %108 {offsets = [0, 0], sizes = [1, 32], strides = [1, 1]} : vector<1x128xf32> to vector<1x32xf32>
    %111 = tpu.concatenate %109, %110 in 1 : vector<1x96xf32>, vector<1x32xf32> -> vector<1x128xf32>
    %112 = arith.select %18, %97, %111 : vector<1x128xi1>, vector<1x128xf32>
    %113 = arith.mulf %108, %112 : vector<1x128xf32>
    %114 = vector.extract_strided_slice %113 {offsets = [0, 64], sizes = [1, 64], strides = [1, 1]} : vector<1x128xf32> to vector<1x64xf32>
    %115 = vector.extract_strided_slice %113 {offsets = [0, 0], sizes = [1, 64], strides = [1, 1]} : vector<1x128xf32> to vector<1x64xf32>
    %116 = tpu.concatenate %114, %115 in 1 : vector<1x64xf32>, vector<1x64xf32> -> vector<1x128xf32>
    %117 = arith.addf %113, %116 : vector<1x128xf32>
    %118 = math.tanh %117 : vector<1x128xf32>
    %119 = arith.mulf %111, %118 : vector<1x128xf32>
    %120 = vector.extract_strided_slice %119 {offsets = [0, 0], sizes = [1, 32], strides = [1, 1]} : vector<1x128xf32> to vector<1x32xf32>
    %121 = vector.extract_strided_slice %6 {offsets = [5, 0], sizes = [1, 128], strides = [1, 1]} : vector<8x128xf32> to vector<1x128xf32>
    %122 = arith.truncf %120 : vector<1x32xf32> to vector<1x32xbf16>
    %cst_19 = arith.constant dense<0.000000e+00> : vector<1x128xf32>
    %123 = tpu.matmul %122, %7, %cst_19 {dimension_numbers = #tpu.dot_dimension_numbers<[1], [0], [0], [1], [0, 0, 1, 1], [], []>} : vector<1x32xbf16>, vector<32x128xbf16>, vector<1x128xf32> -> vector<1x128xf32>
    %124 = arith.addf %121, %123 : vector<1x128xf32>
    %125 = arith.mulf %124, %13 : vector<1x128xf32>
    %126 = math.tanh %125 : vector<1x128xf32>
    %127 = arith.mulf %126, %13 : vector<1x128xf32>
    %128 = arith.addf %127, %16 : vector<1x128xf32>
    %129 = vector.extract_strided_slice %128 {offsets = [0, 32], sizes = [1, 96], strides = [1, 1]} : vector<1x128xf32> to vector<1x96xf32>
    %130 = vector.extract_strided_slice %128 {offsets = [0, 0], sizes = [1, 32], strides = [1, 1]} : vector<1x128xf32> to vector<1x32xf32>
    %131 = tpu.concatenate %129, %130 in 1 : vector<1x96xf32>, vector<1x32xf32> -> vector<1x128xf32>
    %132 = arith.select %18, %117, %131 : vector<1x128xi1>, vector<1x128xf32>
    %133 = arith.mulf %128, %132 : vector<1x128xf32>
    %134 = vector.extract_strided_slice %133 {offsets = [0, 64], sizes = [1, 64], strides = [1, 1]} : vector<1x128xf32> to vector<1x64xf32>
    %135 = vector.extract_strided_slice %133 {offsets = [0, 0], sizes = [1, 64], strides = [1, 1]} : vector<1x128xf32> to vector<1x64xf32>
    %136 = tpu.concatenate %134, %135 in 1 : vector<1x64xf32>, vector<1x64xf32> -> vector<1x128xf32>
    %137 = arith.addf %133, %136 : vector<1x128xf32>
    %138 = math.tanh %137 : vector<1x128xf32>
    %139 = arith.mulf %131, %138 : vector<1x128xf32>
    %140 = vector.extract_strided_slice %139 {offsets = [0, 0], sizes = [1, 32], strides = [1, 1]} : vector<1x128xf32> to vector<1x32xf32>
    %141 = vector.extract_strided_slice %6 {offsets = [6, 0], sizes = [1, 128], strides = [1, 1]} : vector<8x128xf32> to vector<1x128xf32>
    %142 = arith.truncf %140 : vector<1x32xf32> to vector<1x32xbf16>
    %cst_20 = arith.constant dense<0.000000e+00> : vector<1x128xf32>
    %143 = tpu.matmul %142, %7, %cst_20 {dimension_numbers = #tpu.dot_dimension_numbers<[1], [0], [0], [1], [0, 0, 1, 1], [], []>} : vector<1x32xbf16>, vector<32x128xbf16>, vector<1x128xf32> -> vector<1x128xf32>
    %144 = arith.addf %141, %143 : vector<1x128xf32>
    %145 = arith.mulf %144, %13 : vector<1x128xf32>
    %146 = math.tanh %145 : vector<1x128xf32>
    %147 = arith.mulf %146, %13 : vector<1x128xf32>
    %148 = arith.addf %147, %16 : vector<1x128xf32>
    %149 = vector.extract_strided_slice %148 {offsets = [0, 32], sizes = [1, 96], strides = [1, 1]} : vector<1x128xf32> to vector<1x96xf32>
    %150 = vector.extract_strided_slice %148 {offsets = [0, 0], sizes = [1, 32], strides = [1, 1]} : vector<1x128xf32> to vector<1x32xf32>
    %151 = tpu.concatenate %149, %150 in 1 : vector<1x96xf32>, vector<1x32xf32> -> vector<1x128xf32>
    %152 = arith.select %18, %137, %151 : vector<1x128xi1>, vector<1x128xf32>
    %153 = arith.mulf %148, %152 : vector<1x128xf32>
    %154 = vector.extract_strided_slice %153 {offsets = [0, 64], sizes = [1, 64], strides = [1, 1]} : vector<1x128xf32> to vector<1x64xf32>
    %155 = vector.extract_strided_slice %153 {offsets = [0, 0], sizes = [1, 64], strides = [1, 1]} : vector<1x128xf32> to vector<1x64xf32>
    %156 = tpu.concatenate %154, %155 in 1 : vector<1x64xf32>, vector<1x64xf32> -> vector<1x128xf32>
    %157 = arith.addf %153, %156 : vector<1x128xf32>
    %158 = math.tanh %157 : vector<1x128xf32>
    %159 = arith.mulf %151, %158 : vector<1x128xf32>
    %160 = vector.extract_strided_slice %159 {offsets = [0, 0], sizes = [1, 32], strides = [1, 1]} : vector<1x128xf32> to vector<1x32xf32>
    %161 = vector.extract_strided_slice %6 {offsets = [7, 0], sizes = [1, 128], strides = [1, 1]} : vector<8x128xf32> to vector<1x128xf32>
    %162 = arith.truncf %160 : vector<1x32xf32> to vector<1x32xbf16>
    %cst_21 = arith.constant dense<0.000000e+00> : vector<1x128xf32>
    %163 = tpu.matmul %162, %7, %cst_21 {dimension_numbers = #tpu.dot_dimension_numbers<[1], [0], [0], [1], [0, 0, 1, 1], [], []>} : vector<1x32xbf16>, vector<32x128xbf16>, vector<1x128xf32> -> vector<1x128xf32>
    %164 = arith.addf %161, %163 : vector<1x128xf32>
    %165 = arith.mulf %164, %13 : vector<1x128xf32>
    %166 = math.tanh %165 : vector<1x128xf32>
    %167 = arith.mulf %166, %13 : vector<1x128xf32>
    %168 = arith.addf %167, %16 : vector<1x128xf32>
    %169 = vector.extract_strided_slice %168 {offsets = [0, 32], sizes = [1, 96], strides = [1, 1]} : vector<1x128xf32> to vector<1x96xf32>
    %170 = vector.extract_strided_slice %168 {offsets = [0, 0], sizes = [1, 32], strides = [1, 1]} : vector<1x128xf32> to vector<1x32xf32>
    %171 = tpu.concatenate %169, %170 in 1 : vector<1x96xf32>, vector<1x32xf32> -> vector<1x128xf32>
    %172 = arith.select %18, %157, %171 : vector<1x128xi1>, vector<1x128xf32>
    %173 = arith.mulf %168, %172 : vector<1x128xf32>
    %174 = vector.extract_strided_slice %173 {offsets = [0, 64], sizes = [1, 64], strides = [1, 1]} : vector<1x128xf32> to vector<1x64xf32>
    %175 = vector.extract_strided_slice %173 {offsets = [0, 0], sizes = [1, 64], strides = [1, 1]} : vector<1x128xf32> to vector<1x64xf32>
    %176 = tpu.concatenate %174, %175 in 1 : vector<1x64xf32>, vector<1x64xf32> -> vector<1x128xf32>
    %177 = arith.addf %173, %176 : vector<1x128xf32>
    %178 = math.tanh %177 : vector<1x128xf32>
    %179 = arith.mulf %171, %178 : vector<1x128xf32>
    %180 = vector.extract_strided_slice %179 {offsets = [0, 0], sizes = [1, 32], strides = [1, 1]} : vector<1x128xf32> to vector<1x32xf32>
    %181 = tpu.concatenate %40, %60, %80, %100, %120, %140, %160, %180 in 0 : vector<1x32xf32>, vector<1x32xf32>, vector<1x32xf32>, vector<1x32xf32>, vector<1x32xf32>, vector<1x32xf32>, vector<1x32xf32>, vector<1x32xf32> -> vector<8x32xf32>
    %cst_22 = arith.constant 0.000000e+00 : f32
    %182 = vector.broadcast %cst_22 : f32 to vector<8x32xf32>
    %183 = arith.cmpf oge, %181, %182 : vector<8x32xf32>
    %cst_23 = arith.constant 0.00999999977 : f32
    %184 = vector.broadcast %cst_23 : f32 to vector<8x32xf32>
    %185 = arith.mulf %184, %181 : vector<8x32xf32>
    %186 = arith.select %183, %181, %185 : vector<8x32xi1>, vector<8x32xf32>
    %187 = arith.truncf %186 : vector<8x32xf32> to vector<8x32xbf16>
    %c0_24 = arith.constant 0 : index
    %c0_25 = arith.constant 0 : index
    %188 = vector.load %arg5[%c0_24, %c0_25] : memref<32x128xbf16, #tpu.memory_space<vmem>>, vector<32x128xbf16>
    %cst_26 = arith.constant dense<0.000000e+00> : vector<8x128xf32>
    %189 = tpu.matmul %187, %188, %cst_26 {dimension_numbers = #tpu.dot_dimension_numbers<[1], [0], [0], [1], [0, 0, 1, 1], [], []>} : vector<8x32xbf16>, vector<32x128xbf16>, vector<8x128xf32> -> vector<8x128xf32>
    %c0_27 = arith.constant 0 : index
    %c0_28 = arith.constant 0 : index
    %190 = vector.load %arg6[%c0_27, %c0_28] : memref<1x128xf32, #tpu.memory_space<vmem>>, vector<1x128xf32>
    %191 = vector.broadcast %190 : vector<1x128xf32> to vector<8x128xf32>
    %192 = arith.addf %189, %191 : vector<8x128xf32>
    %193 = vector.extract_strided_slice %192 {offsets = [0, 0], sizes = [8, 16], strides = [1, 1]} : vector<8x128xf32> to vector<8x16xf32>
    %cst_29 = arith.constant 0.000000e+00 : f32
    %194 = vector.broadcast %cst_29 : f32 to vector<8x16xf32>
    %195 = arith.cmpf oge, %193, %194 : vector<8x16xf32>
    %cst_30 = arith.constant 0.00999999977 : f32
    %196 = vector.broadcast %cst_30 : f32 to vector<8x16xf32>
    %197 = arith.mulf %196, %193 : vector<8x16xf32>
    %198 = arith.select %195, %193, %197 : vector<8x16xi1>, vector<8x16xf32>
    %199 = arith.truncf %198 : vector<8x16xf32> to vector<8x16xbf16>
    %c0_31 = arith.constant 0 : index
    %c0_32 = arith.constant 0 : index
    %200 = vector.load %arg7[%c0_31, %c0_32] : memref<16x128xbf16, #tpu.memory_space<vmem>>, vector<16x128xbf16>
    %cst_33 = arith.constant dense<0.000000e+00> : vector<8x128xf32>
    %201 = tpu.matmul %199, %200, %cst_33 {dimension_numbers = #tpu.dot_dimension_numbers<[1], [0], [0], [1], [0, 0, 1, 1], [], []>} : vector<8x16xbf16>, vector<16x128xbf16>, vector<8x128xf32> -> vector<8x128xf32>
    %c0_34 = arith.constant 0 : index
    %c0_35 = arith.constant 0 : index
    %202 = vector.load %arg8[%c0_34, %c0_35] : memref<1x128xf32, #tpu.memory_space<vmem>>, vector<1x128xf32>
    %203 = vector.broadcast %202 : vector<1x128xf32> to vector<8x128xf32>
    %204 = arith.addf %201, %203 : vector<8x128xf32>
    %205 = arith.addf %192, %204 : vector<8x128xf32>
    %206 = tpu.concatenate %179, %177 in 0 : vector<1x128xf32>, vector<1x128xf32> -> vector<2x128xf32>
    %cst_36 = arith.constant 0.000000e+00 : f32
    %207 = vector.shape_cast %18 : vector<1x128xi1> to vector<1x128xi1>
    %208 = vector.broadcast %207 : vector<1x128xi1> to vector<2x128xi1>
    %209 = vector.broadcast %cst_36 : f32 to vector<2x128xf32>
    %210 = arith.select %208, %206, %209 : vector<2x128xi1>, vector<2x128xf32>
    %211 = tpu.concatenate %205, %210 in 0 : vector<8x128xf32>, vector<2x128xf32> -> vector<10x128xf32>
    %c0_37 = arith.constant 0 : index
    %c0_38 = arith.constant 0 : index
    %212 = vector.load %arg9[%c0_37, %c0_38] : memref<10x128xf32, #tpu.memory_space<vmem>>, vector<10x128xf32>
    tpu.vector_store %arg9[%c0_37, %c0_38], %211 {strides = array<i32>} : memref<10x128xf32, #tpu.memory_space<vmem>>, vector<10x128xf32>,
    return
  }
}

</mosaic_0001>

<bundles_post_ra>
// kernel: tpu_custom_call.1
= control target key start
LH: loop header
LB: loop body
LE: loop exit
PB: predicated region body
PF: predicated region fallthrough
CT: control target
= control target key end

     0   :  { %14 = vsyncpa [#allocation3], 0  ;;  %s1596_s0 = inlined_call_operand.hbm [shape: f32[8,32], index: 0, kind: input, shape index: {}]   ;;  %s1597_s1 = inlined_call_operand.hbm [shape: bf16[32,128], index: 1, kind: input, shape index: {}]   ;;  %s1598_s2 = inlined_call_operand.hbm [shape: bf16[32,128], index: 2, kind: input, shape index: {}]   ;;  %s1599_s3 = inlined_call_operand.hbm [shape: f32[1,128], index: 3, kind: input, shape index: {}]   ;;  %s1600_s4 = inlined_call_operand.vmem [shape: f32[2,128], index: 4, kind: input, shape index: {}]   ;;  %s1601_s5 = inlined_call_operand.vmem [shape: bf16[32,128], index: 5, kind: input, shape index: {}]   ;;  %s1602_s6 = inlined_call_operand.hbm [shape: f32[1,128], index: 6, kind: input, shape index: {}]   ;;  %s1603_s7 = inlined_call_operand.vmem [shape: bf16[16,128], index: 7, kind: input, shape index: {}]   ;;  %s1604_s8 = inlined_call_operand.vmem [shape: f32[1,128], index: 8, kind: input, shape index: {}]   ;;  %s1605_s9 = inlined_call_operand.hbm [shape: f32[10,128], index: 9, kind: output, shape index: {}]  }
   0x1   :  { %15 = vsyncpa [#allocation6], 0 }
   0x2   :  { %16 = vsyncpa [#allocation9], 0 }
   0x3   :  { %17 = vsyncpa [#allocation4], 0  ;;  %s1276_s30 = smov [#allocation5]   ;;  %s1136_s13 = scalar_lea.hbm %s1597_s1, 256 }
   0x4   :  { %s33_s10 = sshll.u32 %s1276_s30, 4  ;;  %p1137_p0 = scmp.ne.s32.totalorder %s1597_s1, %s1136_s13  ;;  %s34_s10 = int_to_ptr.vmem [resolvable:$true] %s33_s10 }
   0x5   :  { %p1140_p1 = scmp.lt.u32.totalorder %s1136_s13, %s1597_s1 }
   0x7   :  { %p1142_p2 = pnand %p1140_p1, %p1137_p0 }
   0x9   :  { %1145 = shalt.err (!%p1142_p2)
}
   0xa   :  { %s1146_s18 = scalar_lea.vmem %s34_s10, 256  ;;  %p1151_p4 = scmp.lt.s32.totalorder %s34_s10, %s34_s10 }
   0xb   :  { %p1147_p3 = scmp.ne.s32.totalorder %s34_s10, %s1146_s18  ;;  %p1152_p5 = scmp.lt.s32.totalorder %s1146_s18, %s1146_s18 }
   0xd   :  { %p1153_p6 = por %p1152_p5, %p1151_p4 }
   0xf   :  { %p1154_p7 = pnand %p1153_p6, %p1147_p3 }
  0x11   :  { %1157 = shalt.err (!%p1154_p7)
}
  0x12   :  { %s1277_s19 = smov 64   ;;  %s1278_s20 = smov 4  }
  0x13   :  { %39 = dma.hbm_to_vmem [thread:$0]  %s1597_s1, 256, %s34_s10, [#allocation6], %s1277_s19, %s1277_s19, %s1278_s20  }
  0x14   :  { %s1279_s23 = smov [#allocation8]   ;;  %s1280_s25 = smov [#allocation2]  }
  0x15   :  { %s58_s24 = sshll.u32 %s1279_s23, 4  ;;  %s24_s26 = sshll.u32 %s1280_s25, 4  ;;  %s59_s24 = int_to_ptr.vmem [resolvable:$true] %s58_s24  ;;  %s25_s26 = int_to_ptr.vmem [resolvable:$true] %s24_s26 }
  0x16   :  { %s1158_s29 = scalar_lea.hbm %s1599_s3, 16 }
  0x17   :  { %p1159_p8 = scmp.ne.s32.totalorder %s1599_s3, %s1158_s29  ;;  %p1162_p9 = scmp.lt.u32.totalorder %s1158_s29, %s1599_s3 }
  0x19   :  { %p1164_p10 = pnand %p1162_p9, %p1159_p8 }
  0x1b   :  { %1167 = shalt.err (!%p1164_p10)
}
  0x1c   :  { %s1168_s1 = scalar_lea.vmem %s59_s24, 16  ;;  %s1172_s10 = scalar_lea.vmem %s59_s24, 32 }
  0x1d   :  { %p1169_p11 = scmp.ne.s32.totalorder %s59_s24, %s1168_s1  ;;  %p1173_p12 = scmp.lt.s32.totalorder %s59_s24, %s59_s24 }
  0x1e   :  { %p1174_p13 = scmp.lt.s32.totalorder %s1172_s10, %s1168_s1 }
  0x20   :  { %p1175_p0 = por %p1174_p13, %p1173_p12 }
  0x22   :  { %p1176_p1 = pnand %p1175_p0, %p1169_p11 }
  0x24   :  { %1179 = shalt.err (!%p1176_p1)
}
  0x25   :  { %61 = dma.hbm_to_vmem [thread:$0]  %s1599_s3, 16, %s59_s24, [#allocation9]  }
  0x26   :  { %s1180_s18 = scalar_lea.hbm %s1596_s0, 128 }
  0x27   :  { %p1181_p2 = scmp.ne.s32.totalorder %s1596_s0, %s1180_s18  ;;  %p1184_p3 = scmp.lt.u32.totalorder %s1180_s18, %s1596_s0 }
  0x29   :  { %p1186_p4 = pnand %p1184_p3, %p1181_p2 }
  0x2b   :  { %1189 = shalt.err (!%p1186_p4)
}
  0x2c   :  { %s1190_s27 = scalar_lea.vmem %s25_s26, 128  ;;  %p1195_p6 = scmp.lt.s32.totalorder %s25_s26, %s25_s26 }
  0x2d   :  { %p1191_p5 = scmp.ne.s32.totalorder %s25_s26, %s1190_s27  ;;  %p1196_p7 = scmp.lt.s32.totalorder %s1190_s27, %s1190_s27 }
  0x2f   :  { %p1197_p8 = por %p1196_p7, %p1195_p6 }
  0x31   :  { %p1198_p9 = pnand %p1197_p8, %p1191_p5 }
  0x33   :  { %1201 = shalt.err (!%p1198_p9)
}
  0x34   :  { %27 = dma.hbm_to_vmem [thread:$0]  %s1596_s0, 128, %s25_s26, [#allocation3]  }
  0x35   :  { %s1281_s28 = smov [#allocation7]   ;;  %s1282_s30 = smov [#allocation10]  }
  0x36   :  { %s45_s29 = sshll.u32 %s1281_s28, 4  ;;  %s72_s11 = sshll.u32 %s1282_s30, 4  ;;  %s46_s29 = int_to_ptr.vmem [resolvable:$true] %s45_s29  ;;  %s73_s11 = int_to_ptr.vmem [resolvable:$true] %s72_s11 }
  0x37   :  { %s1202_s1 = scalar_lea.hbm %s1598_s2, 256 }
  0x38   :  { %p1203_p10 = scmp.ne.s32.totalorder %s1598_s2, %s1202_s1  ;;  %p1206_p11 = scmp.lt.u32.totalorder %s1202_s1, %s1598_s2 }
  0x3a   :  { %p1208_p12 = pnand %p1206_p11, %p1203_p10 }
  0x3c   :  { %1211 = shalt.err (!%p1208_p12)
}
  0x3d   :  { %s1212_s0 = scalar_lea.vmem %s46_s29, 256  ;;  %p1217_p0 = scmp.lt.s32.totalorder %s46_s29, %s46_s29 }
  0x3e   :  { %p1213_p13 = scmp.ne.s32.totalorder %s46_s29, %s1212_s0  ;;  %p1218_p1 = scmp.lt.s32.totalorder %s1212_s0, %s1212_s0 }
  0x40   :  { %p1219_p2 = por %p1218_p1, %p1217_p0 }
  0x42   :  { %p1220_p3 = pnand %p1219_p2, %p1213_p13 }
  0x44   :  { %1223 = shalt.err (!%p1220_p3)
}
  0x45   :  { %51 = dma.hbm_to_vmem [thread:$0]  %s1598_s2, 256, %s46_s29, [#allocation6], %s1277_s19, %s1277_s19, %s1278_s20  }
  0x46   :  { %s1224_s22 = scalar_lea.hbm %s1602_s6, 16 }
  0x47   :  { %p1225_p4 = scmp.ne.s32.totalorder %s1602_s6, %s1224_s22  ;;  %p1228_p5 = scmp.lt.u32.totalorder %s1224_s22, %s1602_s6 }
  0x49   :  { %p1230_p6 = pnand %p1228_p5, %p1225_p4 }
  0x4b   :  { %1233 = shalt.err (!%p1230_p6)
}
  0x4c   :  { %s1234_s24 = scalar_lea.vmem %s73_s11, 16  ;;  %s1238_s28 = scalar_lea.vmem %s73_s11, 32 }
  0x4d   :  { %p1235_p7 = scmp.ne.s32.totalorder %s73_s11, %s1234_s24  ;;  %p1239_p8 = scmp.lt.s32.totalorder %s73_s11, %s73_s11 }
  0x4e   :  { %p1240_p9 = scmp.lt.s32.totalorder %s1238_s28, %s1234_s24 }
  0x50   :  { %p1241_p10 = por %p1240_p9, %p1239_p8 }
  0x52   :  { %p1242_p11 = pnand %p1241_p10, %p1235_p7 }
  0x54   :  { %1245 = shalt.err (!%p1242_p11)
}
  0x55   :  { %75 = dma.hbm_to_vmem [thread:$0]  %s1602_s6, 16, %s73_s11, [#allocation9]  }
  0x56   :  { %1268 = dma.done.wait [#allocation3], 128  }
  0x57   :  { %1269 = vsyncadd [#allocation3], 4294967168 }
  0x58   :  { %1270 = dma.done.wait [#allocation6], 512  }
  0x59   :  { %1271 = vsyncadd [#allocation6], 4294966784 }
  0x5a   :  { %1272 = dma.done.wait [#allocation9], 32  }
  0x5b   :  { %1273 = vsyncadd [#allocation9], 4294967264  ;;  %v1283_v0 = vmov 0.0   ;;  %vm1284_vm0 = vmmov 0   ;;  %v1097_v1 = vld [vmem:[#allocation5] sm:$0xff]   ;;  %v1412_v2 = vld [vmem:[#allocation7] sm:$0xff]   ;;  %v169_v9 = vlaneseq }
  0x5c   :  { %997 = vmatprep.subr.bf16.mxu0 %v1283_v0  ;;  %1005 = vmatprep.subr.bf16.mxu1 %v1283_v0  ;;  %v1099_v3 = vld [vmem:[#allocation5 + $0x8] sm:$0xff]   ;;  %v1416_v4 = vld [vmem:[#allocation7 + $0x8] sm:$0xff]   ;;  %vm121_vm1 = vcmask 261120   ;;  %v944_v11 = vld [vmem:[#allocation8] ss:$0 sm:$0xff]  ;;  %v1285_v16 = vmov 0.5  }
  0x5d   :  { %1001 = vmatprep.mubr.msk.bf16.mxu0 %vm1284_vm0, %v1283_v0  ;;  %1009 = vmatprep.mubr.msk.bf16.mxu1 %vm1284_vm0, %v1283_v0  ;;  %v96_v5 = vld [vmem:[#allocation2] sm:$0xff]  ;;  %v175_v6 = vld [vmem:[%s1600_s4] sm:$0x1]  ;;  %v1439_v10 = vand.u32 127, %v169_v9  ;;  %s1286_s30 = smov 96   ;;  %vm765_vm4 = vcmask 1040384  }
  0x5e   :  { %998 = vmatpush3.bf16.msra.mxu0 %v1097_v1  ;;  %1006 = vmatpush3.bf16.msra.mxu1 %v1412_v2  ;;  %v97_v7 = vpack.c.bf16 %v96_v5, %v96_v5  ;;  %v177_v8 = vpack.c.bf16 %v175_v6, %v175_v6  ;;  %v176_v29 = vld [vmem:[%s1600_s4 + $0x1] sm:$0x1]  ;;  %vm767_vm5 = vcmask 1041408   ;;  %vm769_vm6 = vcmask 1042432   ;;  %s1287_s16 = smov [#allocation11]  }
  0x5f   :  { %999 = vmatprep.subr.bf16.mxu0 %v1283_v0  ;;  %1007 = vmatprep.subr.bf16.mxu1 %v1283_v0  ;;  %vm171_vm2 = vcmp.ge.s32.totalorder %v1439_v10, 96  ;;  %vm174_vm3 = vcmp.lt.s32.totalorder %v1439_v10, 32  ;;  %vm771_vm7 = vcmask 1043456   ;;  %vm773_vm8 = vcmask 1044480  }
  0x60   :  { %v1446_v17 = vsel %vm171_vm2, 1.0, %v1285_v16  ;;  %v1452_v26 = vsel %vm171_vm2, 0.0, %v1285_v16  ;;  %vm775_vm9 = vcmask 1045504   ;;  %vm777_vm10 = vcmask 1046528  }
  0x61   :  { %vm868_vm13 = vcmask 130048  }
  0x62   :  { %1000 = vmatpush3.bf16.msra.mxu0 %v1099_v3  ;;  %1008 = vmatpush3.bf16.msra.mxu1 %v1416_v4 }
  0x63   :  { %1013 = vmatprep.subr.bf16.mxu0 %v1283_v0  ;;  %1021 = vmatprep.subr.bf16.mxu1 %v1283_v0 }
  0x65   :  { %1002 = vmatmul.mubr.msk.bf16.vlgmr.msra.gmra.mrb[0].mxu0 %vm121_vm1, %v97_v7  ;;  %1010 = vmatmul.mubr.msk.bf16.vlgmr.msra.gmra.mrb[0].mxu1 %vm121_vm1, %v177_v8 }
  0x66   :  { %1014 = vmatpush3.bf16.msra.mxu0 %v1412_v2  ;;  %1017 = vmatprep.mubr.msk.bf16.mxu0 %vm1284_vm0, %v1283_v0 }
  0x67   :  { %1015 = vmatprep.subr.bf16.mxu0 %v1283_v0  ;;  %1022 = vmatpush3.bf16.msra.mxu1 %v1412_v2 }
  0x68   :  { %1025 = vmatprep.mubr.msk.bf16.mxu1 %vm1284_vm0, %v1283_v0  ;;  %1023 = vmatprep.subr.bf16.mxu1 %v1283_v0 }
  0x6a   :  { %1016 = vmatpush3.bf16.msra.mxu0 %v1416_v4 }
  0x6b   :  { %1029 = vmatprep.subr.bf16.mxu0 %v1283_v0  ;;  %1024 = vmatpush3.bf16.msra.mxu1 %v1416_v4 }
  0x6c   :  { %1037 = vmatprep.subr.bf16.mxu1 %v1283_v0 }
 0x138   :  { %v159_v12 = vpop.f32.mrb[0].mxu0  ;;  %v227_v14 = vpop.f32.mrb[0].mxu1 }
 0x139   :  { %v1442_v13 = vadd.f32 %v944_v11, %v159_v12  ;;  %v1003_v15 = vpop.f32.mrb[1].mxu0  ;;  %v1011_v18 = vpop.f32.mrb[1].mxu1 }
 0x13a   :  { %v162_v19 = vpop.f32.mrb[2].mxu0  ;;  %v230_v21 = vpop.f32.mrb[2].mxu1 }
 0x13b   :  { %v233_v20 = vadd.f32 %v227_v14, %v1442_v13  ;;  %v1004_v22 = vpop.f32.mrb[3].mxu0  ;;  %v1012_v23 = vpop.f32.mrb[3].mxu1 }
 0x13d   :  { %v234_v24 = vmul.f32 %v233_v20, %v1446_v17 }
 0x13f   :  { %1104 = vtanh.f32 %v234_v24 }
 0x149   :  { %v1105_v25 = vpop.eup %1104 }
 0x14a   :  { %v236_v27 = vmul.f32 %v1105_v25, %v1446_v17 }
 0x14c   :  { %v237_v28 = vadd.f32 %v236_v27, %v1452_v26 }
 0x14e   :  { %239 = vrot.lane.b32.xlu0 %v237_v28, %s1286_s30 }
 0x1c0   :  { %v240_v30 = vpop.permute.xlu0 %239 }
 0x1c1   :  { %v242_v31 = vsel %vm174_vm3, %v176_v29, %v240_v30 }
 0x1c2   :  { %v243_v32 = vmul.f32 %v242_v31, %v237_v28 }
 0x1c4   :  { %245 = vrot.lane.b32.xlu0 %v243_v32, %s1277_s19 }
 0x236   :  { %v246_v33 = vpop.permute.xlu0 %245 }
 0x237   :  { %v248_v34 = vadd.f32 %v246_v33, %v243_v32 }
 0x239   :  { %1106 = vtanh.f32 %v248_v34 }
 0x243   :  { %v1107_v35 = vpop.eup %1106 }
 0x244   :  { %v1464_v36 = vmul.f32 %v1107_v35, %v240_v30 }
 0x246   :  { %v251_v37 = vpack.c.bf16 %v1464_v36, %v1464_v36 }
 0x248   :  { %1018 = vmatmul.mubr.msk.bf16.vlgmr.msra.gmra.mrb[4].mxu0 %vm121_vm1, %v251_v37 }
 0x249   :  { %1030 = vmatpush3.bf16.msra.mxu0 %v1412_v2  ;;  %1033 = vmatprep.mubr.msk.bf16.mxu0 %vm1284_vm0, %v1283_v0 }
 0x24a   :  { %1031 = vmatprep.subr.bf16.mxu0 %v1283_v0 }
 0x24d   :  { %1032 = vmatpush3.bf16.msra.mxu0 %v1416_v4 }
 0x24e   :  { %1045 = vmatprep.subr.bf16.mxu0 %v1283_v0 }
 0x31b   :  { %v289_v38 = vpop.f32.mrb[4].mxu0 }
 0x31c   :  { %v296_v39 = vrot.slane %v289_v38, 7  ;;  %v1019_v40 = vpop.f32.mrb[5].mxu0 }
 0x31d   :  { %v292_v41 = vpop.f32.mrb[6].mxu0 }
 0x31e   :  { %v298_v42 = vadd.f32 %v296_v39, %v1442_v13  ;;  %v1020_v43 = vpop.f32.mrb[7].mxu0 }
 0x320   :  { %v299_v44 = vmul.f32 %v298_v42, %v1446_v17 }
 0x322   :  { %1108 = vtanh.f32 %v299_v44 }
 0x32c   :  { %v1109_v45 = vpop.eup %1108 }
 0x32d   :  { %v301_v46 = vmul.f32 %v1109_v45, %v1446_v17 }
 0x32f   :  { %v302_v47 = vadd.f32 %v301_v46, %v1452_v26 }
 0x331   :  { %304 = vrot.lane.b32.xlu1 %v302_v47, %s1286_s30 }
 0x3a3   :  { %v305_v48 = vpop.permute.xlu1 %304 }
 0x3a4   :  { %v308_v49 = vrot.slane %v305_v48, 1 }
 0x3a6   :  { %v310_v50 = vsel %vm174_vm3, %v248_v34, %v308_v49 }
 0x3a7   :  { %v312_v51 = vrot.slane %v310_v50, 7 }
 0x3a9   :  { %v314_v52 = vmul.f32 %v312_v51, %v302_v47 }
 0x3ab   :  { %316 = vrot.lane.b32.xlu1 %v314_v52, %s1277_s19 }
 0x41d   :  { %v317_v53 = vpop.permute.xlu1 %316 }
 0x41e   :  { %v319_v54 = vadd.f32 %v317_v53, %v314_v52 }
 0x420   :  { %1110 = vtanh.f32 %v319_v54 }
 0x42a   :  { %v1111_v55 = vpop.eup %1110 }
 0x42b   :  { %v321_v56 = vmul.f32 %v1111_v55, %v305_v48 }
 0x42d   :  { %v322_v57 = vpack.c.bf16 %v321_v56, %v321_v56  ;;  %v766_v20 = vsel %vm765_vm4, %v1464_v36, %v321_v56 }
 0x42f   :  { %v324_v58 = vshrl.u32 %v322_v57, 16 }
 0x431   :  { %1026 = vmatmul.mubr.msk.bf16.vlgmr.msra.gmra.mrb[4].mxu1 %vm121_vm1, %v324_v58 }
 0x432   :  { %1038 = vmatpush3.bf16.msra.mxu1 %v1412_v2  ;;  %1041 = vmatprep.mubr.msk.bf16.mxu1 %vm1284_vm0, %v1283_v0 }
 0x433   :  { %1039 = vmatprep.subr.bf16.mxu1 %v1283_v0 }
 0x436   :  { %1040 = vmatpush3.bf16.msra.mxu1 %v1416_v4 }
 0x437   :  { %1053 = vmatprep.subr.bf16.mxu1 %v1283_v0 }
 0x504   :  { %v363_v59 = vpop.f32.mrb[4].mxu1 }
 0x505   :  { %v370_v60 = vrot.slane %v363_v59, 6  ;;  %v1027_v61 = vpop.f32.mrb[5].mxu1 }
 0x506   :  { %v366_v62 = vpop.f32.mrb[6].mxu1 }
 0x507   :  { %v372_v63 = vadd.f32 %v370_v60, %v1442_v13  ;;  %v1028_v1 = vpop.f32.mrb[7].mxu1 }
 0x509   :  { %v373_v3 = vmul.f32 %v372_v63, %v1446_v17 }
 0x50b   :  { %1112 = vtanh.f32 %v373_v3 }
 0x515   :  { %v1113_v5 = vpop.eup %1112 }
 0x516   :  { %v375_v6 = vmul.f32 %v1113_v5, %v1446_v17 }
 0x518   :  { %v376_v7 = vadd.f32 %v375_v6, %v1452_v26 }
 0x51a   :  { %378 = vrot.lane.b32.xlu0 %v376_v7, %s1286_s30 }
 0x58c   :  { %v379_v8 = vpop.permute.xlu0 %378 }
 0x58d   :  { %v382_v9 = vrot.slane %v379_v8, 1 }
 0x58f   :  { %v384_v11 = vsel %vm174_vm3, %v319_v54, %v382_v9 }
 0x590   :  { %v386_v12 = vrot.slane %v384_v11, 7 }
 0x592   :  { %v388_v14 = vmul.f32 %v386_v12, %v376_v7 }
 0x594   :  { %390 = vrot.lane.b32.xlu1 %v388_v14, %s1277_s19 }
 0x606   :  { %v391_v15 = vpop.permute.xlu1 %390 }
 0x607   :  { %v393_v16 = vadd.f32 %v391_v15, %v388_v14 }
 0x609   :  { %1114 = vtanh.f32 %v393_v16 }
 0x613   :  { %v1115_v18 = vpop.eup %1114 }
 0x614   :  { %v395_v19 = vmul.f32 %v1115_v18, %v379_v8 }
 0x616   :  { %v396_v21 = vpack.c.bf16 %v395_v19, %v395_v19  ;;  %v768_v22 = vsel %vm767_vm5, %v766_v20, %v395_v19 }
 0x618   :  { %v398_v23 = vrot.slane %v396_v21, 1 }
 0x61a   :  { %1034 = vmatmul.mubr.msk.bf16.vlgmr.msra.gmra.mrb[8].mxu0 %vm121_vm1, %v398_v23 }
 0x61b   :  { %1046 = vmatpush3.bf16.msra.mxu0 %v1412_v2  ;;  %1049 = vmatprep.mubr.msk.bf16.mxu0 %vm1284_vm0, %v1283_v0 }
 0x61c   :  { %1047 = vmatprep.subr.bf16.mxu0 %v1283_v0 }
 0x61f   :  { %1048 = vmatpush3.bf16.msra.mxu0 %v1416_v4 }
 0x620   :  { %1061 = vmatprep.subr.bf16.mxu0 %v1283_v0 }
 0x6ed   :  { %v436_v24 = vpop.f32.mrb[8].mxu0 }
 0x6ee   :  { %v443_v25 = vrot.slane %v436_v24, 5  ;;  %v1035_v27 = vpop.f32.mrb[9].mxu0 }
 0x6ef   :  { %v439_v28 = vpop.f32.mrb[10].mxu0 }
 0x6f0   :  { %v445_v29 = vadd.f32 %v443_v25, %v1442_v13  ;;  %v1036_v30 = vpop.f32.mrb[11].mxu0 }
 0x6f2   :  { %v446_v31 = vmul.f32 %v445_v29, %v1446_v17 }
 0x6f4   :  { %1116 = vtanh.f32 %v446_v31 }
 0x6fe   :  { %v1117_v32 = vpop.eup %1116 }
 0x6ff   :  { %v448_v33 = vmul.f32 %v1117_v32, %v1446_v17 }
 0x701   :  { %v449_v34 = vadd.f32 %v448_v33, %v1452_v26 }
 0x703   :  { %451 = vrot.lane.b32.xlu0 %v449_v34, %s1286_s30 }
 0x775   :  { %v452_v35 = vpop.permute.xlu0 %451 }
 0x776   :  { %v455_v36 = vrot.slane %v452_v35, 1 }
 0x778   :  { %v457_v37 = vsel %vm174_vm3, %v393_v16, %v455_v36 }
 0x779   :  { %v459_v38 = vrot.slane %v457_v37, 7 }
 0x77b   :  { %v461_v39 = vmul.f32 %v459_v38, %v449_v34 }
 0x77d   :  { %463 = vrot.lane.b32.xlu1 %v461_v39, %s1277_s19 }
 0x7ef   :  { %v464_v40 = vpop.permute.xlu1 %463 }
 0x7f0   :  { %v466_v41 = vadd.f32 %v464_v40, %v461_v39 }
 0x7f2   :  { %1118 = vtanh.f32 %v466_v41 }
 0x7fc   :  { %v1119_v42 = vpop.eup %1118 }
 0x7fd   :  { %v468_v43 = vmul.f32 %v1119_v42, %v452_v35 }
 0x7ff   :  { %v469_v44 = vpack.c.bf16 %v468_v43, %v468_v43  ;;  %v770_v45 = vsel %vm769_vm6, %v768_v22, %v468_v43 }
 0x801   :  { %v471_v46 = vshrl.u32 %v469_v44, 16 }
 0x803   :  { %v473_v47 = vrot.slane %v471_v46, 1 }
 0x805   :  { %1042 = vmatmul.mubr.msk.bf16.vlgmr.msra.gmra.mrb[8].mxu1 %vm121_vm1, %v473_v47 }
 0x806   :  { %1054 = vmatpush3.bf16.msra.mxu1 %v1412_v2  ;;  %1057 = vmatprep.mubr.msk.bf16.mxu1 %vm1284_vm0, %v1283_v0 }
 0x807   :  { %1055 = vmatprep.subr.bf16.mxu1 %v1283_v0 }
 0x80a   :  { %1056 = vmatpush3.bf16.msra.mxu1 %v1416_v4 }
 0x80b   :  { %1069 = vmatprep.subr.bf16.mxu1 %v1283_v0 }
 0x8d8   :  { %v511_v48 = vpop.f32.mrb[8].mxu1 }
 0x8d9   :  { %v518_v49 = vrot.slane %v511_v48, 4  ;;  %v1043_v50 = vpop.f32.mrb[9].mxu1 }
 0x8da   :  { %v514_v51 = vpop.f32.mrb[10].mxu1 }
 0x8db   :  { %v520_v52 = vadd.f32 %v518_v49, %v1442_v13  ;;  %v1044_v53 = vpop.f32.mrb[11].mxu1 }
 0x8dd   :  { %v521_v54 = vmul.f32 %v520_v52, %v1446_v17 }
 0x8df   :  { %1120 = vtanh.f32 %v521_v54 }
 0x8e9   :  { %v1121_v55 = vpop.eup %1120 }
 0x8ea   :  { %v523_v56 = vmul.f32 %v1121_v55, %v1446_v17 }
 0x8ec   :  { %v524_v57 = vadd.f32 %v523_v56, %v1452_v26 }
 0x8ee   :  { %526 = vrot.lane.b32.xlu0 %v524_v57, %s1286_s30 }
 0x960   :  { %v527_v58 = vpop.permute.xlu0 %526 }
 0x961   :  { %v530_v59 = vrot.slane %v527_v58, 1 }
 0x963   :  { %v532_v60 = vsel %vm174_vm3, %v466_v41, %v530_v59 }
 0x964   :  { %v534_v61 = vrot.slane %v532_v60, 7 }
 0x966   :  { %v536_v62 = vmul.f32 %v534_v61, %v524_v57 }
 0x968   :  { %538 = vrot.lane.b32.xlu1 %v536_v62, %s1277_s19 }
 0x9da   :  { %v539_v63 = vpop.permute.xlu1 %538 }
 0x9db   :  { %v541_v1 = vadd.f32 %v539_v63, %v536_v62 }
 0x9dd   :  { %1122 = vtanh.f32 %v541_v1 }
 0x9e7   :  { %v1123_v3 = vpop.eup %1122 }
 0x9e8   :  { %v543_v5 = vmul.f32 %v1123_v3, %v527_v58 }
 0x9ea   :  { %v544_v6 = vpack.c.bf16 %v543_v5, %v543_v5  ;;  %v772_v7 = vsel %vm771_vm7, %v770_v45, %v543_v5 }
 0x9ec   :  { %v546_v8 = vrot.slane %v544_v6, 2 }
 0x9ee   :  { %1050 = vmatmul.mubr.msk.bf16.vlgmr.msra.gmra.mrb[12].mxu0 %vm121_vm1, %v546_v8 }
 0x9ef   :  { %1062 = vmatpush3.bf16.msra.mxu0 %v1412_v2  ;;  %1065 = vmatprep.mubr.msk.bf16.mxu0 %vm1284_vm0, %v1283_v0 }
 0x9f0   :  { %1063 = vmatprep.subr.bf16.mxu0 %v1283_v0 }
 0x9f3   :  { %1064 = vmatpush3.bf16.msra.mxu0 %v1416_v4 }
 0x9f4   :  { %1077 = vmatprep.subr.bf16.mxu0 %v1283_v0 }
 0xac1   :  { %v584_v9 = vpop.f32.mrb[12].mxu0 }
 0xac2   :  { %v591_v11 = vrot.slane %v584_v9, 3  ;;  %v1051_v12 = vpop.f32.mrb[13].mxu0 }
 0xac3   :  { %v587_v14 = vpop.f32.mrb[14].mxu0 }
 0xac4   :  { %v593_v15 = vadd.f32 %v591_v11, %v1442_v13  ;;  %v1052_v16 = vpop.f32.mrb[15].mxu0 }
 0xac6   :  { %v594_v18 = vmul.f32 %v593_v15, %v1446_v17 }
 0xac8   :  { %1124 = vtanh.f32 %v594_v18 }
 0xad2   :  { %v1125_v2 = vpop.eup %1124 }
 0xad3   :  { %v596_v19 = vmul.f32 %v1125_v2, %v1446_v17 }
 0xad5   :  { %v597_v20 = vadd.f32 %v596_v19, %v1452_v26 }
 0xad7   :  { %599 = vrot.lane.b32.xlu0 %v597_v20, %s1286_s30 }
 0xb49   :  { %v600_v4 = vpop.permute.xlu0 %599 }
 0xb4a   :  { %v603_v21 = vrot.slane %v600_v4, 1 }
 0xb4c   :  { %v605_v22 = vsel %vm174_vm3, %v541_v1, %v603_v21  ;;  %v1103_v21 = vld [vmem:[%s1603_s7] sm:$0xff]   ;;  %s930_s7 = sshll.u32 %s1287_s16, 4  ;;  %s931_s7 = int_to_ptr.vmem [resolvable:$true] %s930_s7 }
 0xb4d   :  { %v607_v23 = vrot.slane %v605_v22, 7  ;;  %v958_v22 = vld [vmem:[#allocation10] ss:$0 sm:$0xff]  ;;  %s1246_s0 = scalar_lea.vmem %s931_s7, 256  ;;  %p1251_p13 = scmp.lt.s32.totalorder %s931_s7, %s931_s7 }
 0xb4e   :  { %p1247_p12 = scmp.ne.s32.totalorder %s931_s7, %s1246_s0  ;;  %p1252_p0 = scmp.lt.s32.totalorder %s1246_s0, %s1246_s0 }
 0xb4f   :  { %v609_v24 = vmul.f32 %v607_v23, %v597_v20 }
 0xb50   :  { %p1253_p1 = por %p1252_p0, %p1251_p13 }
 0xb51   :  { %611 = vrot.lane.b32.xlu1 %v609_v24, %s1277_s19 }
 0xb52   :  { %p1254_p2 = pnand %p1253_p1, %p1247_p12 }
 0xbc3   :  { %v612_v25 = vpop.permute.xlu1 %611 }
 0xbc4   :  { %v614_v27 = vadd.f32 %v612_v25, %v609_v24 }
 0xbc6   :  { %1126 = vtanh.f32 %v614_v27 }
 0xbd0   :  { %v1127_v28 = vpop.eup %1126 }
 0xbd1   :  { %v616_v29 = vmul.f32 %v1127_v28, %v600_v4 }
 0xbd3   :  { %v617_v30 = vpack.c.bf16 %v616_v29, %v616_v29  ;;  %v774_v31 = vsel %vm773_vm8, %v772_v7, %v616_v29 }
 0xbd5   :  { %v619_v32 = vshrl.u32 %v617_v30, 16 }
 0xbd7   :  { %v621_v33 = vrot.slane %v619_v32, 2 }
 0xbd9   :  { %1058 = vmatmul.mubr.msk.bf16.vlgmr.msra.gmra.mrb[12].mxu1 %vm121_vm1, %v621_v33 }
 0xbda   :  { %1073 = vmatprep.mubr.msk.bf16.mxu1 %vm1284_vm0, %v1283_v0 }
 0xcac   :  { %v659_v34 = vpop.f32.mrb[12].mxu1 }
 0xcad   :  { %v666_v35 = vrot.slane %v659_v34, 2  ;;  %v1059_v36 = vpop.f32.mrb[13].mxu1 }
 0xcae   :  { %v662_v37 = vpop.f32.mrb[14].mxu1 }
 0xcaf   :  { %v668_v38 = vadd.f32 %v666_v35, %v1442_v13  ;;  %v1060_v39 = vpop.f32.mrb[15].mxu1 }
 0xcb1   :  { %v669_v40 = vmul.f32 %v668_v38, %v1446_v17 }
 0xcb3   :  { %1128 = vtanh.f32 %v669_v40 }
 0xcbd   :  { %v1129_v41 = vpop.eup %1128 }
 0xcbe   :  { %v671_v42 = vmul.f32 %v1129_v41, %v1446_v17 }
 0xcc0   :  { %v672_v43 = vadd.f32 %v671_v42, %v1452_v26 }
 0xcc2   :  { %674 = vrot.lane.b32.xlu0 %v672_v43, %s1286_s30 }
 0xd34   :  { %v675_v44 = vpop.permute.xlu0 %674 }
 0xd35   :  { %v678_v45 = vrot.slane %v675_v44, 1 }
 0xd37   :  { %v680_v46 = vsel %vm174_vm3, %v614_v27, %v678_v45 }
 0xd38   :  { %v682_v47 = vrot.slane %v680_v46, 7 }
 0xd3a   :  { %v684_v48 = vmul.f32 %v682_v47, %v672_v43 }
 0xd3c   :  { %686 = vrot.lane.b32.xlu1 %v684_v48, %s1277_s19 }
 0xdae   :  { %v687_v49 = vpop.permute.xlu1 %686 }
 0xdaf   :  { %v689_v50 = vadd.f32 %v687_v49, %v684_v48 }
 0xdb1   :  { %1130 = vtanh.f32 %v689_v50 }
 0xdbb   :  { %v1131_v51 = vpop.eup %1130 }
 0xdbc   :  { %v691_v52 = vmul.f32 %v1131_v51, %v675_v44 }
 0xdbe   :  { %v692_v53 = vpack.c.bf16 %v691_v52, %v691_v52  ;;  %v776_v54 = vsel %vm775_vm9, %v774_v31, %v691_v52  ;;  %v962_v31 = vld [vmem:[%s1604_s8] ss:$0 sm:$0xff] }
 0xdc0   :  { %v694_v55 = vrot.slane %v692_v53, 3 }
 0xdc2   :  { %1066 = vmatmul.mubr.msk.bf16.vlgmr.msra.gmra.mrb[16].mxu0 %vm121_vm1, %v694_v55 }
 0xdc3   :  { %1079 = vmatprep.mubr.msk.bf16.mxu0 %vm1284_vm0, %v1283_v0  ;;  %1078 = vmatpush3.bf16.msra.mxu0 %v1103_v21 }
 0xe95   :  { %v732_v56 = vpop.f32.mrb[16].mxu0 }
 0xe96   :  { %v739_v57 = vrot.slane %v732_v56, 1  ;;  %v1067_v58 = vpop.f32.mrb[17].mxu0 }
 0xe97   :  { %v735_v59 = vpop.f32.mrb[18].mxu0 }
 0xe98   :  { %v741_v60 = vadd.f32 %v739_v57, %v1442_v13  ;;  %v1068_v61 = vpop.f32.mrb[19].mxu0  ;;  %v1101_v13 = vld [vmem:[%s1601_s5] sm:$0xff]  }
 0xe99   :  { %1070 = vmatpush3.bf16.msra.mxu1 %v1101_v13 }
 0xe9a   :  { %v742_v62 = vmul.f32 %v741_v60, %v1446_v17  ;;  %1071 = vmatprep.subr.bf16.mxu1 %v1283_v0 }
 0xe9c   :  { %1132 = vtanh.f32 %v742_v62 }
 0xea6   :  { %v1133_v63 = vpop.eup %1132 }
 0xea7   :  { %v744_v1 = vmul.f32 %v1133_v63, %v1446_v17  ;;  %v1102_v17 = vld [vmem:[%s1601_s5 + $0x8] sm:$0xff]  }
 0xea8   :  { %1072 = vmatpush3.bf16.msra.mxu1 %v1102_v17 }
 0xea9   :  { %v745_v3 = vadd.f32 %v744_v1, %v1452_v26 }
 0xeab   :  { %747 = vrot.lane.b32.xlu0 %v745_v3, %s1286_s30 }
 0xf1d   :  { %v748_v5 = vpop.permute.xlu0 %747 }
 0xf1e   :  { %v751_v6 = vrot.slane %v748_v5, 1 }
 0xf20   :  { %v753_v7 = vsel %vm174_vm3, %v689_v50, %v751_v6 }
 0xf21   :  { %v755_v8 = vrot.slane %v753_v7, 7 }
 0xf23   :  { %v757_v9 = vmul.f32 %v755_v8, %v745_v3 }
 0xf25   :  { %759 = vrot.lane.b32.xlu1 %v757_v9, %s1277_s19 }
 0xf97   :  { %v760_v26 = vpop.permute.xlu1 %759 }
 0xf98   :  { %v762_v11 = vadd.f32 %v760_v26, %v757_v9 }
 0xf9a   :  { %1134 = vtanh.f32 %v762_v11  ;;  %v917_v16 = vrot.slane %v762_v11, 6 }
 0xfa4   :  { %v1135_v12 = vpop.eup %1134 }
 0xfa5   :  { %v764_v14 = vmul.f32 %v1135_v12, %v748_v5 }
 0xfa7   :  { %v914_v15 = vrot.slane %v764_v14, 7  ;;  %v778_v18 = vsel %vm777_vm10, %v776_v54, %v764_v14 }
 0xfa8   :  { %vm779_vm11 = vcmp.ge.f32.partialorder %v778_v18, 0.0  ;;  %v780_v2 = vmul.f32 0.01, %v778_v18 }
 0xfa9   :  { %v919_v19 = vsel %vm765_vm4, %v914_v15, %v917_v16 }
 0xfaa   :  { %v922_v0 = vsel %vm174_vm3, %v919_v19, 0.0  ;;  %v781_v20 = vsel %vm779_vm11, %v778_v18, %v780_v2 }
 0xfab   :  { %924 = vst [vmem:[#allocation11 + $0x8] sm:$0x3] %v922_v0  ;;  %v782_v4 = vpack.c.bf16 %v781_v20, %v781_v20 }
 0xfad   :  { %1074 = vmatmul.mubr.msk.bf16.vlgmr.msra.gmra.mrb[16].mxu1 %vm121_vm1, %v782_v4 }
0x1080   :  { %v843_v23 = vpop.f32.mrb[16].mxu1 }
0x1081   :  { %v844_v24 = vadd.f32 %v958_v22, %v843_v23  ;;  %v1075_v25 = vpop.f32.mrb[17].mxu1 }
0x1082   :  { %v846_v27 = vpop.f32.mrb[18].mxu1 }
0x1083   :  { %vm849_vm12 = vcmp.ge.f32.partialorder %v844_v24, 0.0  ;;  %v850_v28 = vmul.f32 0.01, %v844_v24  ;;  %v1076_v29 = vpop.f32.mrb[19].mxu1 }
0x1085   :  { %v851_v10 = vsel %vm849_vm12, %v844_v24, %v850_v28 }
0x1086   :  { %v852_v30 = vpack.c.bf16 %v851_v10, %v851_v10 }
0x1088   :  { %1080 = vmatmul.mubr.msk.bf16.vlgmr.msra.gmra.mrb[20].mxu0 %vm868_vm13, %v852_v30 }
0x115b   :  { %v906_v32 = vpop.f32.mrb[20].mxu0 }
0x115c   :  { %v907_v33 = vadd.f32 %v962_v31, %v906_v32  ;;  %v1081_v34 = vpop.f32.mrb[21].mxu0 }
0x115d   :  { %v909_v35 = vpop.f32.mrb[22].mxu0 }
0x115e   :  { %v912_v36 = vadd.f32 %v907_v33, %v844_v24  ;;  %v1082_v37 = vpop.f32.mrb[23].mxu0 }
0x1160   :  { %923 = vst [vmem:[#allocation11] sm:$0xff] %v912_v36 }
0x1161   :  { %1257 = shalt.err (!%p1254_p2)
}
0x1162   :  { %s1258_s8 = scalar_lea.hbm %s1605_s9, 256 }
0x1163   :  { %p1259_p3 = scmp.ne.s32.totalorder %s1605_s9, %s1258_s8  ;;  %p1262_p4 = scmp.lt.u32.totalorder %s1258_s8, %s1605_s9 }
0x1165   :  { %p1264_p5 = pnand %p1262_p4, %p1259_p3 }
0x1167   :  { %1267 = shalt.err (!%p1264_p5)
}
0x1168   :  { %s1288_s25 = smov 128   ;;  %s1289_s27 = smov 8  }
0x1169   :  { %936 = dma.vmem_to_hbm [thread:$0]  %s931_s7, 256, %s1605_s9, [#allocation4], %s1288_s25, %s1288_s25, %s1289_s27  }
0x116a   :  { %1274 = dma.done.wait [#allocation4], 256  }
0x116b   :  { %1275 = vsyncadd [#allocation4], 4294967040 }
0x116c   :  { %940 = vsyncpa [#allocation3], 1 }
0x116d   :  { %941 = vsyncpa [#allocation6], 1 }
0x116e   :  { %942 = vsyncpa [#allocation9], 1 }
0x116f   :  { %943 = vsyncpa [#allocation4], 1 }

</bundles_post_ra>
